<compile_context>
chip_gen: v7x
topology: tpu7x:2x2x1
jax: 0.10.0
libtpu: 0.0.40
codegen_flags: <defaults>
</compile_context>

<pallas_src>
import jax
import jax.numpy as jnp
from jax import lax
from jax.experimental import pallas as pl
from jax.experimental.pallas import tpu as pltpu

_LANES = 128
_WIDE = 2 * _LANES  # 256 interleaved x,y lanes per packed row


def _round_up(x, m):
    return ((x + m - 1) // m) * m


def _static_int_power(x, p):
    """x**p for a *static* Python int p >= 1, as repeated VPU multiplies."""
    acc = x
    for _ in range(p - 1):
        acc = acc * x
    return acc


def _make_grid_kernel(p):
    """Elementwise (t - i)**p on a (br, 256) interleaved tile."""
    def kernel(i_ref, t_ref, o_ref):
        d = t_ref[...].astype(jnp.float32) - i_ref[...].astype(jnp.float32)
        o_ref[...] = _static_int_power(d, p)
    return kernel


def _make_sum_kernel(p, block_rows, chunk_rows, valid_rows, need_mask):
    """Per-block partial sum of (t - i)**p folded into an (8, 256) tile."""
    def kernel(i_ref, t_ref, part_ref):
        blk_row0 = pl.program_id(0) * block_rows

        def body(c, acc):
            r0 = pl.multiple_of(c * chunk_rows, chunk_rows)
            ic = i_ref[pl.ds(r0, chunk_rows), :].astype(jnp.float32)
            tc = t_ref[pl.ds(r0, chunk_rows), :].astype(jnp.float32)
            pw = _static_int_power(tc - ic, p)
            if need_mask:
                # Rows past the true row count are Pallas edge padding
                # (unspecified contents) -> zero their contribution.
                row = blk_row0 + r0 + lax.broadcasted_iota(
                    jnp.int32, (chunk_rows, _WIDE), 0)
                pw = jnp.where(row < valid_rows, pw, 0.0)
            s = pw[0:8, :]
            for k in range(8, chunk_rows, 8):
                s = s + pw[k:k + 8, :]
            return acc + s

        acc = lax.fori_loop(0, block_rows // chunk_rows, body,
                            jnp.zeros((8, _WIDE), jnp.float32))
        part_ref[...] = acc  # full-tile, unmasked store
    return kernel


def fixation_power_loss(inp, tgt, p=2, agg=True, *, block_rows=None,
                        min_pallas_n=65536):
    """JAX/Pallas equivalent of FixationPowerLoss.forward."""
    assert inp.ndim == 2 and inp.shape[1] == 2
    assert tgt.shape == inp.shape
    # TODO(synk): non-integer exponents (full float_power semantics) not ported.
    assert isinstance(p, int) and p >= 1, "static integer exponent >= 1 expected"
    n = inp.shape[0]

    # Small-N fast path: pallas_call launch overhead dwarfs ~4*N flops and the
    # fused XLA elementwise path is already at roofline there.
    if n < min_pallas_n:
        diff = tgt.astype(jnp.float32) - inp.astype(jnp.float32)
        loss_grid = jnp.sum(_static_int_power(diff, p), axis=-1)
        return {"dec_loss": jnp.mean(loss_grid) if agg else loss_grid}

    if block_rows is None:
        block_rows = 2048 if agg else 1024

    # Keep bf16 inputs narrow (cast in-kernel); everything else computes f32.
    plane_dtype = jnp.promote_types(inp.dtype, tgt.dtype)
    if plane_dtype != jnp.bfloat16 and plane_dtype != jnp.float32:
        plane_dtype = jnp.float32
    sub = 16 if plane_dtype == jnp.bfloat16 else 8   # sublane tile granularity

    rows = -(-n // _LANES)          # 128 fixations (256 interleaved lanes) per row

    def to_plane(a):
        flat = a.astype(plane_dtype).reshape(-1)
        pad = rows * _WIDE - flat.shape[0]
        if pad:   # only when n % 128 != 0; otherwise a free row-major reshape
            flat = jnp.pad(flat, (0, pad))
        return flat.reshape(rows, _WIDE)

    ip, tp = to_plane(inp), to_plane(tgt)

    br = min(_round_up(block_rows, sub), _round_up(rows, sub))
    grid_steps = -(-rows // br)
    if grid_steps == 1 and rows > sub:
        # Keep >= 2 parallel blocks so both v7x TensorCores get work.
        br = _round_up(-(-rows // 2), sub)
        grid_steps = -(-rows // br)
    need_mask = grid_steps * br > rows   # uneven (edge-padded) last block

    in_spec = pl.BlockSpec((br, _WIDE), lambda i: (i, 0))
    cparams = pltpu.CompilerParams(dimension_semantics=("parallel",))

    if agg:
        chunk = next(c for c in (32, 16, 8) if br % c == 0)
        partials = pl.pallas_call(
            _make_sum_kernel(p, br, chunk, rows, need_mask),
            out_shape=jax.ShapeDtypeStruct((grid_steps * 8, _WIDE), jnp.float32),
            grid=(grid_steps,),
            in_specs=[in_spec, in_spec],
            out_specs=pl.BlockSpec((8, _WIDE), lambda i: (i, 0)),
            compiler_params=cparams,
        )(ip, tp)
        # TODO(synk): plain f32 summation; for very large N a pairwise/tree
        # reduction of the partials would track the torch f64 reference better.
        return {"dec_loss": jnp.sum(partials) / n}

    pw = pl.pallas_call(
        _make_grid_kernel(p),
        out_shape=jax.ShapeDtypeStruct((rows, _WIDE), jnp.float32),
        grid=(grid_steps,),
        in_specs=[in_spec, in_spec],
        out_specs=in_spec,
        compiler_params=cparams,
    )(ip, tp)
    # x+y pair fold on the interleaved output (fused reshape+reduce in XLA).
    return {"dec_loss": pw.reshape(-1, 2).sum(-1)[:n]}


if __name__ == "__main__":
    key = jax.random.PRNGKey(0)
    k1, k2 = jax.random.split(key)

    def ref_loss(x, t, p):
        d = t.astype(jnp.float32) - x.astype(jnp.float32)
        return jnp.sum(d ** p, axis=-1)

    # 1) Pallas path, N multiple of 128 (pad-free reshape), small blocks so the
    #    grid is multi-step with an uneven (masked) last block.
    N1 = 128 * 40
    x1 = jax.random.normal(k1, (N1, 2), dtype=jnp.float32)
    t1 = jax.random.normal(k2, (N1, 2), dtype=jnp.float32)
    agg1 = fixation_power_loss(x1, t1, p=2, agg=True,
                               block_rows=16, min_pallas_n=0)["dec_loss"]
    grid1 = fixation_power_loss(x1, t1, p=2, agg=False,
                                block_rows=16, min_pallas_n=0)["dec_loss"]
    jax.block_until_ready((agg1, grid1))
    r1 = ref_loss(x1, t1, 2)
    assert grid1.shape == (N1,)
    assert jnp.allclose(grid1, r1, atol=1e-5, rtol=1e-5)
    assert jnp.allclose(agg1, jnp.mean(r1), atol=1e-4, rtol=1e-4)

    # Default block_rows (auto-split into >= 2 parallel blocks), odd exponent.
    agg1_p3 = fixation_power_loss(x1, t1, p=3, agg=True,
                                  min_pallas_n=0)["dec_loss"]
    jax.block_until_ready(agg1_p3)
    assert jnp.allclose(agg1_p3, jnp.mean(ref_loss(x1, t1, 3)),
                        atol=1e-3, rtol=1e-3)

    # 2) N not a multiple of 128 -> single flat zero-pad path.
    N2 = 5000
    x2 = jax.random.normal(k1, (N2, 2), dtype=jnp.float32)
    t2 = jax.random.normal(k2, (N2, 2), dtype=jnp.float32)
    agg2 = fixation_power_loss(x2, t2, p=2, agg=True, min_pallas_n=0)["dec_loss"]
    grid2 = fixation_power_loss(x2, t2, p=2, agg=False, min_pallas_n=0)["dec_loss"]
    jax.block_until_ready((agg2, grid2))
    r2 = ref_loss(x2, t2, 2)
    assert grid2.shape == (N2,)
    assert jnp.allclose(grid2, r2, atol=1e-5, rtol=1e-5)
    assert jnp.allclose(agg2, jnp.mean(r2), atol=1e-4, rtol=1e-4)

    # 3) bf16 inputs: DMA'd narrow, cast to f32 inside the kernel.
    xb = x1.astype(jnp.bfloat16)
    tb = t1.astype(jnp.bfloat16)
    aggb = fixation_power_loss(xb, tb, p=2, agg=True,
                               block_rows=32, min_pallas_n=0)["dec_loss"]
    jax.block_until_ready(aggb)
    assert jnp.allclose(aggb, jnp.mean(ref_loss(xb, tb, 2)),
                        atol=1e-3, rtol=1e-3)

    # 4) Small-N fast path (plain fused XLA, default threshold).
    N3 = 8
    x3 = jax.random.normal(k1, (N3, 2), dtype=jnp.float32)
    t3 = jax.random.normal(k2, (N3, 2), dtype=jnp.float32)
    small = fixation_power_loss(x3, t3, p=2, agg=False)["dec_loss"]
    jax.block_until_ready(small)
    assert jnp.allclose(small, ref_loss(x3, t3, 2), atol=1e-6)

    print("KERNEL_OK")
</pallas_src>

<mosaic_0001>
module attributes {stable_mosaic.version = 11 : i64} {
  func.func @kernel(%arg0: i32, %arg1: memref<16x256xf32, #tpu.memory_space<vmem>>, %arg2: memref<16x256xf32, #tpu.memory_space<vmem>>, %arg3: memref<8x256xf32, #tpu.memory_space<vmem>>) attributes {dimension_semantics = [#tpu.dimension_semantics<parallel>], iteration_bounds = array<i64: 3>, scalar_prefetch = 0 : i64, scratch_operands = 0 : i64, tpu.core_type = #tpu.core_type<tc>, window_params = [{transform_indices = @transform_0, window_bounds = array<i64: 16, 256>}, {transform_indices = @transform_1, window_bounds = array<i64: 16, 256>}, {transform_indices = @transform_2, window_bounds = array<i64: 8, 256>}]} {
    %c16_i32 = arith.constant 16 : i32
    %0 = arith.muli %arg0, %c16_i32 : i32
    %cst = arith.constant 0.000000e+00 : f32
    %1 = vector.broadcast %cst : f32 to vector<8x256xf32>
    %c0_i32 = arith.constant 0 : i32
    %c16_i32_0 = arith.constant 16 : i32
    %2 = arith.muli %c0_i32, %c16_i32_0 : i32
    %3 = tpu.assume_multiple %2, 16 : i32
    %4 = arith.index_cast %3 : i32 to index
    %c0 = arith.constant 0 : index
    %5 = vector.load %arg1[%4, %c0] : memref<16x256xf32, #tpu.memory_space<vmem>>, vector<16x256xf32>
    %6 = arith.index_cast %3 : i32 to index
    %c0_1 = arith.constant 0 : index
    %7 = vector.load %arg2[%6, %c0_1] : memref<16x256xf32, #tpu.memory_space<vmem>>, vector<16x256xf32>
    %8 = arith.subf %7, %5 : vector<16x256xf32>
    %9 = arith.mulf %8, %8 : vector<16x256xf32>
    %10 = arith.addi %0, %3 : i32
    %11 = tpu.iota {dimensions = array<i32: 0>} : vector<16x256xi32>
    %12 = vector.broadcast %10 : i32 to vector<16x256xi32>
    %13 = arith.addi %12, %11 : vector<16x256xi32>
    %c40_i32 = arith.constant 40 : i32
    %14 = vector.broadcast %c40_i32 : i32 to vector<16x256xi32>
    %15 = arith.cmpi slt, %13, %14 : vector<16x256xi32>
    %cst_2 = arith.constant 0.000000e+00 : f32
    %16 = vector.broadcast %cst_2 : f32 to vector<16x256xf32>
    %17 = arith.select %15, %9, %16 : vector<16x256xi1>, vector<16x256xf32>
    %18 = vector.extract_strided_slice %17 {offsets = [0, 0], sizes = [8, 256], strides = [1, 1]} : vector<16x256xf32> to vector<8x256xf32>
    %19 = vector.extract_strided_slice %17 {offsets = [8, 0], sizes = [8, 256], strides = [1, 1]} : vector<16x256xf32> to vector<8x256xf32>
    %20 = arith.addf %18, %19 : vector<8x256xf32>
    %21 = arith.addf %1, %20 : vector<8x256xf32>
    %c1_i32 = arith.constant 1 : i32
    %c0_3 = arith.constant 0 : index
    %c0_4 = arith.constant 0 : index
    %22 = vector.load %arg3[%c0_3, %c0_4] : memref<8x256xf32, #tpu.memory_space<vmem>>, vector<8x256xf32>
    tpu.vector_store %arg3[%c0_3, %c0_4], %21 {strides = array<i32>} : memref<8x256xf32, #tpu.memory_space<vmem>>, vector<8x256xf32>,
    return
  }
  func.func @transform_0(%arg0: i32) -> (i32, i32) {
    %c0_i32 = arith.constant 0 : i32
    %c0_i32_0 = arith.constant 0 : i32
    return %arg0, %c0_i32 : i32, i32
  }
  func.func @transform_1(%arg0: i32) -> (i32, i32) {
    %c0_i32 = arith.constant 0 : i32
    %c0_i32_0 = arith.constant 0 : i32
    return %arg0, %c0_i32 : i32, i32
  }
  func.func @transform_2(%arg0: i32) -> (i32, i32) {
    %c0_i32 = arith.constant 0 : i32
    %c0_i32_0 = arith.constant 0 : i32
    return %arg0, %c0_i32 : i32, i32
  }
}

</mosaic_0001>

<bundles_post_ra>
// kernel: tpu_custom_call.1
= control target key start
LH: loop header
LB: loop body
LE: loop exit
PB: predicated region body
PF: predicated region fallthrough
CT: control target
= control target key end

     0   :  { %7 = vsyncpa [#allocation3], 0  ;;  %s824_s0 = inlined_call_operand.hbm [shape: f32[40,256], index: 0, kind: input, shape index: {}]   ;;  %s825_s1 = inlined_call_operand.hbm [shape: f32[40,256], index: 1, kind: input, shape index: {}]   ;;  %s826_s2 = inlined_call_operand.hbm [shape: f32[24,256], index: 2, kind: output, shape index: {}]  }
   0x1   :  { %9 = vsyncpa [#allocation3 + $0x1], 0 }
   0x2   :  { %10 = vsyncpa [#allocation6], 0 }
   0x3   :  { %12 = vsyncpa [#allocation6 + $0x1], 0 }
   0x4   :  { %13 = vsyncpa [#allocation4], 0 }
   0x5   :  { %15 = vsyncpa [#allocation4 + $0x1], 0  ;;  %s612_s9 = smov 0   ;;  %s614_s10 = smov 0  }
   0x6   :  { %s616_s11 = smov 0   ;;  %s618_s12 = smov 0  }
   0x7 LB: > { %s633_s13 = sadd.s32 4294967295, %s588_s12   ;;  %s379_s14 = sadd.s32 4294967294, %s588_s12   ;;  %s588_s12 = sphi %s618_s12, %s837_s12   ;;  %s584_s11 = sphi %s616_s11, %s836_s11   ;;  %s580_s10 = sphi %s614_s10, %s835_s10   ;;  %s576_s9 = sphi %s612_s9, %s834_s9  }
   0x8   : > { %s637_s15 = sadd.s32 1, %s588_s12   ;;  %s28_s16 = sadd.s32 1, %s584_s11 }
   0x9   : > { %s25_s17 = ssub.s32 %s588_s12, %s637_s15  ;;  %p35_p0 = scmp.ne.s32.totalorder %s584_s11, %s580_s10 }
   0xa   : > { %p26_p1 = scmp.eq.s32.totalorder %s25_s17, 0  ;;  %p36_p2 = scmp.eq.s32.totalorder %s588_s12, 0 }
   0xb   : > { %p41_p3 = scmp.ne.s32.totalorder %s580_s10, %s576_s9  ;;  %p42_p4 = scmp.eq.s32.totalorder %s633_s13, 0 }
   0xc   : > { %s649_s18 = scalar_select %p26_p1, %s584_s11, %s28_s16  }
   0xd   : > { %p651_p5 = por %p36_p2, %p35_p0  ;;  %p655_p6 = por %p42_p4, %p41_p3 }
   0xe   : > { %p91_p7 = scmp.eq.s32.totalorder %s633_s13, 2  ;;  %p97_p8 = scmp.eq.s32.totalorder %s379_s14, 2 }
   0xf   : > { %p381_p11 = scmp.ge.s32.totalorder %s588_s12, 3 }
  0x10   : > { %p660_p9 = por %p91_p7, %p35_p0  ;;  %p664_p10 = por %p97_p8, %p41_p3 }
  0x11   : > { %113 = sbr.rel (%p381_p11) target bundleno = 94 (0x5e), region = 16 }
  0x12   : > { %s830_s21 = scalar_select %p660_p9, 1, 0 }
  0x13   : > { %s831_s22 = scalar_select %p664_p10, 1, 0 }
  0x18   : > { %116 = sbr.rel (!%p651_p5) target bundleno = 59 (0x3b), region = 20  ;;  %s117_s23 = sand.u32 (%p651_p5), 1, %s584_s11  }
  0x19   : > { %s383_s24 = sshll.u32 (%p651_p5), %s588_s12, 1  ;;  %s382_s25 = sshll.u32 (%p651_p5), %s117_s23, 5 }
  0x1a   : > { %s123_s26 = ssub.s32 (%p651_p5), 5, %s383_s24  ;;  %s676_s29 = scalar_lea.sflag (%p651_p5), [#allocation3], %s117_s23 }
  0x1b   : > { %p124_p12 = scmp.lt.s32.totalorder (%p651_p5), %s123_s26, 2  ;;  %s121_s30 = scalar_lea.vmem (%p651_p5), [#allocation2], %s382_s25 }
  0x1f   : > { %s839_s26 = smov (!%p124_p12, %s123_s26), 2 }
  0x20   : > { %s673_s27 = sshll.u32 %s839_s26, 8 }
  0x21   : > { %s129_s28 = ssub.s32 512, %s673_s27 }
  0x22   : > { %130 = vsyncadd %s676_s29, %s129_s28  ;;  %p386_p13 = scmp.ne.s32.totalorder %s673_s27, 0  ;;  %s412_s3 = sshll.u32 %s588_s12, 9 }
  0x23   : > { %s684_s6 = scalar_lea.hbm %s824_s0, %s412_s3  ;;  %s136_s7 = sshll.u32 %s121_s30, 4  ;;  %s686_s7 = int_to_ptr.vmem [resolvable:$true] %s136_s7 }
  0x24   : > { %s462_s8 = scalar_lea.hbm %s684_s6, %s673_s27  ;;  %s466_s17 = scalar_lea.hbm %s824_s0, 1280 }
  0x25   : > { %p463_p0 = scmp.ne.s32.totalorder %s684_s6, %s462_s8  ;;  %p467_p3 = scmp.lt.u32.totalorder %s684_s6, %s824_s0 }
  0x26   : > { %p468_p4 = scmp.lt.u32.totalorder %s466_s17, %s462_s8  ;;  %p470_p8 = scmp.lt.u32.totalorder %s462_s8, %s684_s6 }
  0x27   : > { %p464_p1 = pnand %p463_p0, %p386_p13 }
  0x28   : > { %p469_p7 = por %p468_p4, %p467_p3 }
  0x29   : > { %p465_p2 = pneg %p464_p1 }
  0x2a   : > { %p471_p11 = por %p470_p8, %p469_p7 }
  0x2c   : > { %p472_p12 = pnand %p471_p11, %p465_p2 }
  0x2e   : > { %475 = shalt.err (!%p472_p12)
}
  0x2f   : > { %s476_s25 = scalar_lea.vmem %s686_s7, %s673_s27  ;;  %s590_s26 = smov [#allocation2]  }
  0x30   : > { %p477_p0 = scmp.ne.s32.totalorder %s686_s7, %s476_s25  ;;  %s480_s28 = sshll.u32 %s590_s26, 4  ;;  %s481_s28 = int_to_ptr.vmem [resolvable:$false] %s480_s28 }
  0x31   : > { %s482_s30 = scalar_lea.vmem %s481_s28, 1024  ;;  %p483_p9 = scmp.lt.s32.totalorder %s686_s7, %s481_s28 }
  0x32   : > { %p478_p1 = pnand %p477_p0, %p386_p13  ;;  %p484_p3 = scmp.lt.s32.totalorder %s482_s30, %s476_s25 }
  0x34   : > { %p479_p10 = pneg %p478_p1  ;;  %p485_p4 = por %p484_p3, %p483_p9 }
  0x36   : > { %p486_p7 = pnand %p485_p4, %p479_p10 }
  0x38   : > { %489 = shalt.err (!%p486_p7)
}
  0x39   : > { %s591_s3 = smov 256   ;;  %s592_s4 = smov 16  }
  0x3a   : > { %142 = dma.hbm_to_vmem [thread:$0]  (%p386_p13), %s684_s6, %s673_s27, %s686_s7, %s676_s29, %s591_s3, %s591_s3, %s592_s4  }
  0x3b PF: > { %145 = sbr.rel (!%p651_p5) target bundleno = 94 (0x5e), region = 24  ;;  %s146_s5 = sand.u32 (%p651_p5), 1, %s584_s11  }
  0x3c   : > { %s392_s8 = sshll.u32 (%p651_p5), %s588_s12, 1  ;;  %s391_s14 = sshll.u32 (%p651_p5), %s146_s5, 5 }
  0x3d   : > { %s152_s16 = ssub.s32 (%p651_p5), 5, %s392_s8  ;;  %s720_s24 = scalar_lea.sflag (%p651_p5), [#allocation6], %s146_s5 }
  0x3e   : > { %p153_p9 = scmp.lt.s32.totalorder (%p651_p5), %s152_s16, 2  ;;  %s150_s27 = scalar_lea.vmem (%p651_p5), [#allocation5], %s391_s14 }
  0x42   : > { %s841_s16 = smov (!%p153_p9, %s152_s16), 2 }
  0x43   : > { %s717_s17 = sshll.u32 %s841_s16, 8 }
  0x44   : > { %s158_s23 = ssub.s32 512, %s717_s17 }
  0x45   : > { %159 = vsyncadd %s720_s24, %s158_s23  ;;  %p395_p5 = scmp.ne.s32.totalorder %s717_s17, 0  ;;  %s415_s19 = sshll.u32 %s588_s12, 9 }
  0x46   : > { %s728_s7 = scalar_lea.hbm %s825_s1, %s415_s19  ;;  %s165_s25 = sshll.u32 %s150_s27, 4  ;;  %s730_s25 = int_to_ptr.vmem [resolvable:$true] %s165_s25 }
  0x47   : > { %s490_s26 = scalar_lea.hbm %s728_s7, %s717_s17  ;;  %s494_s3 = scalar_lea.hbm %s825_s1, 1280 }
  0x48   : > { %p491_p10 = scmp.ne.s32.totalorder %s728_s7, %s490_s26  ;;  %p495_p8 = scmp.lt.u32.totalorder %s728_s7, %s825_s1 }
  0x49   : > { %p496_p11 = scmp.lt.u32.totalorder %s494_s3, %s490_s26  ;;  %p498_p0 = scmp.lt.u32.totalorder %s490_s26, %s728_s7 }
  0x4a   : > { %p492_p13 = pnand %p491_p10, %p395_p5 }
  0x4b   : > { %p497_p12 = por %p496_p11, %p495_p8 }
  0x4c   : > { %p493_p2 = pneg %p492_p13 }
  0x4d   : > { %p499_p1 = por %p498_p0, %p497_p12 }
  0x4f   : > { %p500_p3 = pnand %p499_p1, %p493_p2 }
  0x51   : > { %503 = shalt.err (!%p500_p3)
}
  0x52   : > { %s504_s8 = scalar_lea.vmem %s730_s25, %s717_s17  ;;  %s593_s14 = smov [#allocation5]  }
  0x53   : > { %p505_p4 = scmp.ne.s32.totalorder %s730_s25, %s504_s8  ;;  %s508_s16 = sshll.u32 %s593_s14, 4  ;;  %s509_s16 = int_to_ptr.vmem [resolvable:$false] %s508_s16 }
  0x54   : > { %s510_s23 = scalar_lea.vmem %s509_s16, 1024  ;;  %p511_p10 = scmp.lt.s32.totalorder %s730_s25, %s509_s16 }
  0x55   : > { %p506_p7 = pnand %p505_p4, %p395_p5  ;;  %p512_p13 = scmp.lt.s32.totalorder %s510_s23, %s504_s8 }
  0x57   : > { %p507_p9 = pneg %p506_p7  ;;  %p513_p8 = por %p512_p13, %p511_p10 }
  0x59   : > { %p514_p11 = pnand %p513_p8, %p507_p9 }
  0x5b   : > { %517 = shalt.err (!%p514_p11)
}
  0x5c   : > { %s594_s27 = smov 256   ;;  %s595_s19 = smov 16  }
  0x5d   : > { %171 = dma.hbm_to_vmem [thread:$0]  (%p395_p5), %s728_s7, %s717_s17, %s730_s25, %s720_s24, %s594_s27, %s594_s27, %s595_s19  }
  0x5e PF: > { %p400_p2 = scmp.ge.s32.totalorder %s588_s12, 1  ;;  %p173_p12 = scmp.lt.s32.totalorder %s588_s12, 4 }
  0x60   : > { %p174_p0 = pnand %p400_p2, %p173_p12 }
  0x61   : > { %s760_s29 = sand.u32 (!%p174_p0), 1, %s580_s10  }
  0x62   : > { %177 = sbr.rel (%p174_p0) target bundleno = 135 (0x87), region = 28  ;;  %s401_s6 = sshll.u32 (!%p174_p0), %s760_s29, 5 }
  0x63   : > { %s180_s26 = scalar_lea.sflag (!%p174_p0), [#allocation3], %s760_s29  ;;  %s183_s28 = scalar_lea.vmem (!%p174_p0), [#allocation2], %s401_s6 }
  0x69   : > { %563 = dma.done.wait (%p655_p6), %s180_s26, 512  }
  0x6a   : > { %565 = vsyncadd (%p655_p6), %s180_s26, 4294966784  ;;  %s189_s17 = scalar_lea.sflag [#allocation6], %s760_s29  ;;  %s192_s24 = scalar_lea.vmem [#allocation5], %s401_s6 }
  0x6b   : > { %567 = dma.done.wait (%p655_p6), %s189_s17, 512  }
  0x6c   : > { %569 = vsyncadd (%p655_p6), %s189_s17, 4294966784  ;;  %s404_s7 = sshll.u32 %s633_s13, 4  ;;  %v253_v0 = vlaneseq  ;;  %s403_s25 = sshll.u32 %s760_s29, 4  ;;  %v234_v6 = vld [vmem:[%s183_s28] sm:$0xff]  ;;  %v236_v7 = vld [vmem:[%s183_s28 + $0x10] sm:$0xff] }
  0x6d   : > { %v256_v2 = vstv %s404_s7  ;;  %v240_v8 = vld [vmem:[%s192_s24] sm:$0xff]  ;;  %v242_v9 = vld [vmem:[%s192_s24 + $0x10] sm:$0xff]  ;;  %v235_v11 = vld [vmem:[%s183_s28 + $0x8] sm:$0xff]  ;;  %s217_s20 = scalar_lea.vmem [#allocation7], %s403_s25  ;;  %s416_s3 = sshll.u32 %s633_s13, 8 }
  0x6e   : > { %v254_v1 = vshrl.u32 %v253_v0, 7  ;;  %v244_v10 = vsub.f32 %v240_v8, %v234_v6  ;;  %v237_v12 = vld [vmem:[%s183_s28 + $0x18] sm:$0xff]  ;;  %v246_v13 = vsub.f32 %v242_v9, %v236_v7  ;;  %v241_v14 = vld [vmem:[%s192_s24 + $0x8] sm:$0xff]  ;;  %s286_s30 = sshll.u32 %s217_s20, 4  ;;  %s783_s8 = scalar_lea.hbm %s826_s2, %s416_s3  ;;  %s778_s30 = int_to_ptr.vmem [resolvable:$true] %s286_s30 }
  0x6f   : > { %v243_v15 = vld [vmem:[%s192_s24 + $0x18] sm:$0xff]  ;;  %v245_v17 = vsub.f32 %v241_v14, %v235_v11  ;;  %s272_s14 = scalar_lea.sflag [#allocation4], %s760_s29  ;;  %s518_s13 = scalar_lea.vmem %s778_s30, 256 }
  0x70   : > { %v255_v3 = vadd.s32 8, %v254_v1  ;;  %v257_v4 = vadd.s32 %v256_v2, %v254_v1  ;;  %v248_v16 = vmul.f32 %v244_v10, %v244_v10  ;;  %v247_v18 = vsub.f32 %v243_v15, %v237_v12  ;;  %p519_p6 = scmp.ne.s32.totalorder %s778_s30, %s518_s13  ;;  %p832_p5 = scmp.ne.s32.totalorder %s830_s21, 0 }
  0x71   : > { %v250_v19 = vmul.f32 %v246_v13, %v246_v13  ;;  %v249_v21 = vmul.f32 %v245_v17, %v245_v17  ;;  %s596_s16 = smov [#allocation7]  }
  0x72   : > { %v258_v5 = vadd.s32 %v256_v2, %v255_v3  ;;  %vm259_vm0 = vcmp.lt.s32.totalorder %v257_v4, 40  ;;  %v251_v22 = vmul.f32 %v247_v18, %v247_v18  ;;  %p520_p1 = pnand %p519_p6, %p832_p5  ;;  %s522_s23 = sshll.u32 %s596_s16, 4  ;;  %s523_s23 = int_to_ptr.vmem [resolvable:$false] %s522_s23 }
  0x73   : > { %v261_v20 = vsel %vm259_vm0, %v248_v16, 0.0  ;;  %v262_v25 = vsel %vm259_vm0, %v249_v21, 0.0  ;;  %s524_s27 = scalar_lea.vmem %s523_s23, 512  ;;  %p525_p4 = scmp.lt.s32.totalorder %s778_s30, %s523_s23 }
  0x74   : > { %vm260_vm1 = vcmp.lt.s32.totalorder %v258_v5, 40  ;;  %p521_p3 = pneg %p520_p1  ;;  %p526_p7 = scmp.lt.s32.totalorder %s524_s27, %s518_s13 }
  0x75   : > { %v263_v23 = vsel %vm260_vm1, %v250_v19, 0.0  ;;  %v264_v26 = vsel %vm260_vm1, %v251_v22, 0.0 }
  0x76   : > { %v265_v24 = vadd.f32 %v263_v23, %v261_v20  ;;  %v266_v27 = vadd.f32 %v264_v26, %v262_v25  ;;  %p527_p9 = por %p526_p7, %p525_p4 }
  0x78   : > { %269 = vst [vmem:[%s217_s20] sm:$0xff] %v265_v24  ;;  %270 = vst [vmem:[%s217_s20 + $0x8] sm:$0xff] %v266_v27  ;;  %p528_p10 = pnand %p527_p9, %p521_p3 }
  0x7a   : > { %531 = shalt.err (!%p528_p10)
}
  0x7b   : > { %s532_s19 = scalar_lea.hbm %s783_s8, 256  ;;  %s536_s26 = scalar_lea.hbm %s826_s2, 768 }
  0x7c   : > { %p533_p13 = scmp.ne.s32.totalorder %s783_s8, %s532_s19  ;;  %p537_p2 = scmp.lt.u32.totalorder %s783_s8, %s826_s2 }
  0x7d   : > { %p538_p12 = scmp.lt.u32.totalorder %s536_s26, %s532_s19  ;;  %p540_p6 = scmp.lt.u32.totalorder %s532_s19, %s783_s8 }
  0x7e   : > { %p534_p8 = pnand %p533_p13, %p832_p5 }
  0x7f   : > { %p539_p0 = por %p538_p12, %p537_p2 }
  0x80   : > { %p535_p11 = pneg %p534_p8 }
  0x81   : > { %p541_p1 = por %p540_p6, %p539_p0 }
  0x83   : > { %p542_p3 = pnand %p541_p1, %p535_p11 }
  0x85   : > { %545 = shalt.err (!%p542_p3)
}
  0x86   : > { %419 = dma.vmem_to_hbm [thread:$0]  (%p832_p5), %s778_s30, 256, %s783_s8, %s272_s14  }
  0x87 PF: > { %p425_p4 = scmp.ge.s32.totalorder %s588_s12, 2  ;;  %s298_s24 = sand.u32 1, %s576_s9  }
  0x88   : > { %p833_p7 = scmp.ne.s32.totalorder %s831_s22, 0  ;;  %s299_s7 = scalar_lea.sflag [#allocation4], %s298_s24 }
  0x8a   : > { %p422_p9 = pnand %p425_p4, %p833_p7 }
  0x8c   : > { %571 = dma.done.wait (!%p422_p9), %s299_s7, 256  }
  0x8d   : > { %573 = vsyncadd (!%p422_p9), %s299_s7, 4294967040  ;;  %p18_p10 = scmp.ge.s32.totalorder %s637_s15, 5   ;;  %s834_s9 = smov %s580_s10 }
  0x8e   : > { %s835_s10 = smov %s584_s11  ;;  %s836_s11 = smov %s649_s18 }
  0x8f   : > { %s837_s12 = smov %s637_s15  ;;  %20 = sbr.rel (!%p18_p10) target bundleno = 7 (0x7), region = 88 }
  0x96   :  { %304 = vsyncpa [#allocation3], 1 }
  0x97   :  { %306 = vsyncpa [#allocation3 + $0x1], 1 }
  0x98   :  { %307 = vsyncpa [#allocation6], 1 }
  0x99   :  { %309 = vsyncpa [#allocation6 + $0x1], 1 }
  0x9a   :  { %310 = vsyncpa [#allocation4], 1 }
  0x9b   :  { %312 = vsyncpa [#allocation4 + $0x1], 1 }

</bundles_post_ra>
